<compile_context>
chip_gen: v7x
topology: tpu7x:2x2x1
jax: 0.10.0
libtpu: 0.0.40
codegen_flags: <defaults>
</compile_context>

<pallas_src>
import functools

import jax
import jax.numpy as jnp
from jax import lax
from jax.experimental import pallas as pl
from jax.experimental.pallas import tpu as pltpu


def _mean_pooler_kernel(x_ref, w_ref, b_ref, o_ref, acc_ref, *,
                        inv_s, rsub, n_chunks):
    # x_ref: (TB, TS, H), w_ref: (H, H) [out, in], b_ref: (1, H),
    # o_ref: (TB, H), acc_ref: (TB, rsub, H) f32 scratch (lives across seq steps).
    j = pl.program_id(1)

    @pl.when(j == 0)
    def _init():
        acc_ref[...] = jnp.zeros_like(acc_ref)

    if rsub == 1:
        # Fallback when the seq tile is not a multiple of the sublane pack:
        # per-step cross-sublane reduce (original scheme), f32 accumulation.
        acc_ref[...] += jnp.sum(x_ref[...].astype(jnp.float32), axis=1,
                                keepdims=True)
    else:
        # Sublane-group accumulation: each inner step adds one aligned
        # (TB, rsub, H) slab into the f32 accumulator with pure elementwise
        # VPU adds — no per-step XLU reduce.  The fori_loop keeps the f32-cast
        # live range to one slab, so a big DMA tile does not become a big vreg
        # live range (no flip into the spill-bound regime).
        if n_chunks == 1:
            acc_ref[...] += x_ref[...].astype(jnp.float32)
        else:
            def body(c, carry):
                start = pl.multiple_of(c * rsub, rsub)
                acc_ref[...] += x_ref[:, pl.ds(start, rsub), :].astype(
                    jnp.float32)
                return carry

            lax.fori_loop(0, n_chunks, body, 0, unroll=(n_chunks <= 8))

    @pl.when(j == pl.num_programs(1) - 1)
    def _finalize():
        # Single deferred cross-sublane reduce + one scalar multiply for /S.
        mean_tok = jnp.sum(acc_ref[...], axis=1) * inv_s        # (TB, H) f32
        w = w_ref[...]                                           # native dtype
        # y = mean_tok @ W.T without an explicit transpose: contract W's
        # in_features axis (dim 1).  For bf16 W, cast only the tiny (TB, H)
        # mean so the MXU takes its native low-precision path with f32 output.
        lhs = mean_tok if w.dtype == jnp.float32 else mean_tok.astype(w.dtype)
        y = lax.dot_general(
            lhs, w,
            dimension_numbers=(((1,), (1,)), ((), ())),
            preferred_element_type=jnp.float32)
        y = y + b_ref[...].astype(jnp.float32)                   # (1, H) bcast
        o_ref[...] = jnp.tanh(y).astype(o_ref.dtype)


def _sublane_align(dtype):
    """Min sublane multiple for a block's second-to-last dim: 8/f32, 16/bf16, 32/int8."""
    return max(8, 32 // jnp.dtype(dtype).itemsize)


def _largest_divisor_tile(dim, cap, align):
    """Largest divisor of `dim` that is <= cap and (multiple of align or == dim)."""
    if dim <= cap:
        return dim
    for t in range(min(cap, dim), 0, -1):
        if dim % t == 0 and (t % align == 0 or t == dim):
            return t
    return dim


def _vmem_capacity_bytes():
    """Physical VMEM per TensorCore; conservative 64 MiB fallback (v7x-sized)."""
    try:
        info = pltpu.get_tpu_info()
        cap = getattr(info, "vmem_capacity_bytes", None)
        if cap:
            return int(cap)
    except Exception:
        pass
    return 64 * 1024 * 1024


def bert_mean_pooler(hidden_states, weight, bias, *, tb=None, ts=None):
    """hidden_states: [B, S, H]; weight: [H, H] (out, in); bias: [H]."""
    B, S, H = hidden_states.shape
    x_dtype = hidden_states.dtype
    x_bytes = jnp.dtype(x_dtype).itemsize
    w_item = jnp.dtype(weight.dtype).itemsize
    b_item = jnp.dtype(bias.dtype).itemsize

    align_b = _sublane_align(x_dtype)   # (tb, H) output block sublane rule
    align_s = _sublane_align(x_dtype)   # (ts, H) x-tile sublane rule

    # ---- batch tile: prefer >= 2 tiles so the "parallel" axis can shard
    # across v7x's two TensorCores; keep tb sublane-aligned and modest so the
    # output/accumulator blocks stay small. ---------------------------------
    if tb is None:
        if B >= 2 * align_b:
            cap_b = max(align_b, min(B // 2, 64))
            tb = _largest_divisor_tile(B, cap_b, align_b)
        else:
            tb = B
    assert B % tb == 0

    # ---- device-VMEM-derived activation tile budget -----------------------
    vmem_cap = _vmem_capacity_bytes()
    usable = int(vmem_cap * 0.85)       # stay well below physical VMEM

    w_total = int(weight.size) * w_item
    b_total = max(H * b_item, 1024)
    o_tile = tb * H * x_bytes
    acc_bound = tb * max(align_s, 8) * H * 4
    # Double-buffered W/bias/out + accumulator + compiler-internal headroom.
    # TODO(synk): reclaim the second W/bias buffer via pl.Buffered(1) on their
    # constant-index BlockSpecs once that pipeline_mode path is verified here.
    fixed = 2 * w_total + 2 * b_total + 2 * o_tile + acc_bound + (2 << 20)

    if ts is None:
        # ~vmem/6 per x tile: ~21 MiB on 128-MiB parts, ~10 MiB on v7x.
        x_tile_budget = max(1 << 20, min((usable - fixed) // 2, vmem_cap // 6))
        cap_s = max(1, x_tile_budget // max(1, tb * H * x_bytes))
        ts = _largest_divisor_tile(S, cap_s, align_s)
    assert S % ts == 0

    # Sublane group size for the deferred in-kernel reduce.
    if ts % align_s == 0:
        rsub = align_s
    elif ts % 8 == 0:
        rsub = 8
    else:
        rsub = 1
    n_chunks = ts // rsub if rsub > 1 else 1

    # ---- VMEM limit from the actual tile footprint -------------------------
    x_tile = tb * ts * H * x_bytes
    acc_bytes = tb * rsub * H * 4
    est = 2 * x_tile + 2 * w_total + 2 * b_total + 2 * o_tile + acc_bytes
    vmem_limit = int(min(max(est * 1.5, 8 << 20), usable))

    grid = (B // tb, S // ts)
    bias2d = bias.reshape(1, H)

    cost = pl.CostEstimate(
        flops=int(B * S * H + 2 * B * H * H),
        transcendentals=int(B * H),
        bytes_accessed=int(B * S * H * x_bytes + H * H * w_item
                           + H * b_item + B * H * x_bytes),
    )

    kernel = functools.partial(_mean_pooler_kernel, inv_s=float(1.0 / S),
                               rsub=rsub, n_chunks=n_chunks)

    return pl.pallas_call(
        kernel,
        out_shape=jax.ShapeDtypeStruct((B, H), x_dtype),
        grid_spec=pltpu.PrefetchScalarGridSpec(
            num_scalar_prefetch=0,
            grid=grid,
            in_specs=[
                # Activations: tiled over (batch, seq); streamed/pipelined.
                pl.BlockSpec((tb, ts, H), lambda i, j: (i, j, 0)),
                # Weight/bias: constant block index -> fetched once, resident.
                pl.BlockSpec((H, H), lambda i, j: (0, 0)),
                pl.BlockSpec((1, H), lambda i, j: (0, 0)),
            ],
            # Output block index constant along the seq axis -> resident
            # accumulator-style output, written only in the finalize branch.
            out_specs=pl.BlockSpec((tb, H), lambda i, j: (i, 0)),
            scratch_shapes=[pltpu.VMEM((tb, rsub, H), jnp.float32)],
        ),
        compiler_params=pltpu.CompilerParams(
            dimension_semantics=("parallel", "arbitrary"),
            vmem_limit_bytes=vmem_limit,
        ),
        cost_estimate=cost,
    )(hidden_states, weight, bias2d)


if __name__ == "__main__":
    key = jax.random.PRNGKey(0)
    k_x, k_w, k_b = jax.random.split(key, 3)

    B, S, H = 2, 8, 32  # batch, seq, hidden (small demo shapes)

    hidden_states = jax.random.normal(k_x, (B, S, H), dtype=jnp.float32)
    # Deterministic synthetic "Linear(H, H)" params (not a checkpoint).
    bound = 1.0 / (H ** 0.5)
    weight = jax.random.uniform(k_w, (H, H), minval=-bound, maxval=bound,
                                dtype=jnp.float32)
    bias = jax.random.uniform(k_b, (H,), minval=-bound, maxval=bound,
                              dtype=jnp.float32)

    out = bert_mean_pooler(hidden_states, weight, bias)
    out = jax.block_until_ready(out)

    # Reference check in plain JAX.
    ref = jnp.tanh(jnp.mean(hidden_states, axis=1) @ weight.T + bias)
    assert out.shape == (B, H)
    assert jnp.allclose(out, ref, atol=1e-5, rtol=1e-5)

    print("KERNEL_OK")
</pallas_src>

<mosaic_0001>
module attributes {stable_mosaic.version = 11 : i64} {
  func.func @_mean_pooler_kernel(%arg0: i32, %arg1: i32, %arg2: memref<2x8x32xf32, #tpu.memory_space<vmem>>, %arg3: memref<32x32xf32, #tpu.memory_space<vmem>>, %arg4: memref<1x32xf32, #tpu.memory_space<vmem>>, %arg5: memref<2x32xf32, #tpu.memory_space<vmem>>, %arg6: memref<2x8x32xf32, #tpu.memory_space<vmem>>) attributes {dimension_semantics = [#tpu.dimension_semantics<parallel>, #tpu.dimension_semantics<arbitrary>], iteration_bounds = array<i64: 1, 1>, scalar_prefetch = 0 : i64, scratch_operands = 1 : i64, tpu.core_type = #tpu.core_type<tc>, window_params = [{transform_indices = @transform_0, window_bounds = array<i64: 2, 8, 32>}, {pipeline_mode = #tpu.pipeline_mode<synchronous>, transform_indices = @transform_1, window_bounds = array<i64: 32, 32>}, {pipeline_mode = #tpu.pipeline_mode<synchronous>, transform_indices = @transform_2, window_bounds = array<i64: 1, 32>}, {transform_indices = @transform_3, window_bounds = array<i64: 2, 32>}]} {
    %c0_i32 = arith.constant 0 : i32
    %0 = arith.cmpi eq, %arg1, %c0_i32 : i32
    %1 = arith.extui %0 : i1 to i32
    %c0_i32_0 = arith.constant 0 : i32
    %2 = arith.cmpi ne, %1, %c0_i32_0 : i32
    scf.if %2 {
      %cst = arith.constant 0.000000e+00 : f32
      %10 = vector.broadcast %cst : f32 to vector<2x8x32xf32>
      %c0_11 = arith.constant 0 : index
      %c0_12 = arith.constant 0 : index
      %c0_13 = arith.constant 0 : index
      %11 = vector.load %arg6[%c0_11, %c0_12, %c0_13] : memref<2x8x32xf32, #tpu.memory_space<vmem>>, vector<2x8x32xf32>
      tpu.vector_store %arg6[%c0_11, %c0_12, %c0_13], %10 {strides = array<i32>} : memref<2x8x32xf32, #tpu.memory_space<vmem>>, vector<2x8x32xf32>,
    } else {
    }
    %c0 = arith.constant 0 : index
    %c0_1 = arith.constant 0 : index
    %c0_2 = arith.constant 0 : index
    %3 = vector.load %arg6[%c0, %c0_1, %c0_2] : memref<2x8x32xf32, #tpu.memory_space<vmem>>, vector<2x8x32xf32>
    %c0_3 = arith.constant 0 : index
    %c0_4 = arith.constant 0 : index
    %c0_5 = arith.constant 0 : index
    %4 = vector.load %arg2[%c0_3, %c0_4, %c0_5] : memref<2x8x32xf32, #tpu.memory_space<vmem>>, vector<2x8x32xf32>
    %5 = arith.addf %3, %4 : vector<2x8x32xf32>
    %c0_6 = arith.constant 0 : index
    %c0_7 = arith.constant 0 : index
    %c0_8 = arith.constant 0 : index
    %6 = vector.load %arg6[%c0_6, %c0_7, %c0_8] : memref<2x8x32xf32, #tpu.memory_space<vmem>>, vector<2x8x32xf32>
    tpu.vector_store %arg6[%c0_6, %c0_7, %c0_8], %5 {strides = array<i32>} : memref<2x8x32xf32, #tpu.memory_space<vmem>>, vector<2x8x32xf32>,
    %c0_i32_9 = arith.constant 0 : i32
    %7 = arith.cmpi eq, %arg1, %c0_i32_9 : i32
    %8 = arith.extui %7 : i1 to i32
    %c0_i32_10 = arith.constant 0 : i32
    %9 = arith.cmpi ne, %8, %c0_i32_10 : i32
    scf.if %9 {
      %c0_11 = arith.constant 0 : index
      %c0_12 = arith.constant 0 : index
      %c0_13 = arith.constant 0 : index
      %10 = vector.load %arg6[%c0_11, %c0_12, %c0_13] : memref<2x8x32xf32, #tpu.memory_space<vmem>>, vector<2x8x32xf32>
      %cst = arith.constant dense<0.000000e+00> : vector<2x32xf32>
      %11 = vector.multi_reduction <add>, %10, %cst [1] : vector<2x8x32xf32> to vector<2x32xf32>
      %cst_14 = arith.constant 1.250000e-01 : f32
      %12 = vector.broadcast %cst_14 : f32 to vector<2x32xf32>
      %13 = arith.mulf %11, %12 : vector<2x32xf32>
      %c0_15 = arith.constant 0 : index
      %c0_16 = arith.constant 0 : index
      %14 = vector.load %arg3[%c0_15, %c0_16] : memref<32x32xf32, #tpu.memory_space<vmem>>, vector<32x32xf32>
      %cst_17 = arith.constant dense<0.000000e+00> : vector<2x32xf32>
      %15 = tpu.matmul %13, %14, %cst_17 {dimension_numbers = #tpu.dot_dimension_numbers<[1], [1], [0], [0], [0, 0, 1, 0], [], []>} : vector<2x32xf32>, vector<32x32xf32>, vector<2x32xf32> -> vector<2x32xf32>
      %c0_18 = arith.constant 0 : index
      %c0_19 = arith.constant 0 : index
      %16 = vector.load %arg4[%c0_18, %c0_19] : memref<1x32xf32, #tpu.memory_space<vmem>>, vector<1x32xf32>
      %17 = vector.broadcast %16 : vector<1x32xf32> to vector<2x32xf32>
      %18 = arith.addf %15, %17 : vector<2x32xf32>
      %19 = math.tanh %18 : vector<2x32xf32>
      %c0_20 = arith.constant 0 : index
      %c0_21 = arith.constant 0 : index
      %20 = vector.load %arg5[%c0_20, %c0_21] : memref<2x32xf32, #tpu.memory_space<vmem>>, vector<2x32xf32>
      tpu.vector_store %arg5[%c0_20, %c0_21], %19 {strides = array<i32>} : memref<2x32xf32, #tpu.memory_space<vmem>>, vector<2x32xf32>,
    } else {
    }
    return
  }
  func.func @transform_0(%arg0: i32, %arg1: i32) -> (i32, i32, i32) {
    %c0_i32 = arith.constant 0 : i32
    %c0_i32_0 = arith.constant 0 : i32
    return %arg0, %arg1, %c0_i32 : i32, i32, i32
  }
  func.func @transform_1(%arg0: i32, %arg1: i32) -> (i32, i32) {
    %c0_i32 = arith.constant 0 : i32
    %c0_i32_0 = arith.constant 0 : i32
    %c0_i32_1 = arith.constant 0 : i32
    return %c0_i32, %c0_i32_0 : i32, i32
  }
  func.func @transform_2(%arg0: i32, %arg1: i32) -> (i32, i32) {
    %c0_i32 = arith.constant 0 : i32
    %c0_i32_0 = arith.constant 0 : i32
    %c0_i32_1 = arith.constant 0 : i32
    return %c0_i32, %c0_i32_0 : i32, i32
  }
  func.func @transform_3(%arg0: i32, %arg1: i32) -> (i32, i32) {
    %c0_i32 = arith.constant 0 : i32
    %c0_i32_0 = arith.constant 0 : i32
    return %arg0, %c0_i32 : i32, i32
  }
}

</mosaic_0001>

<bundles_post_ra>
// kernel: tpu_custom_call.1
= control target key start
LH: loop header
LB: loop body
LE: loop exit
PB: predicated region body
PF: predicated region fallthrough
CT: control target
= control target key end

     0   :  { %8 = vsyncpa [#allocation4], 0  ;;  %s386_s0 = inlined_call_operand.hbm [shape: f32[2,8,32], index: 0, kind: input, shape index: {}]   ;;  %s387_s1 = inlined_call_operand.hbm [shape: f32[32,32], index: 1, kind: input, shape index: {}]   ;;  %s388_s2 = inlined_call_operand.vmem [shape: f32[1,32], index: 2, kind: input, shape index: {}]   ;;  %s389_s3 = inlined_call_operand.hbm [shape: f32[2,32], index: 3, kind: output, shape index: {}]  }
   0x1   :  { %9 = vsyncpa [#allocation7], 0 }
   0x2   :  { %10 = vsyncpa [#allocation5], 0  ;;  %s310_s12 = smov [#allocation3]   ;;  %s238_s16 = scalar_lea.hbm %s386_s0, 256 }
   0x3   :  { %s16_s13 = sshll.u32 %s310_s12, 4  ;;  %p239_p0 = scmp.ne.s32.totalorder %s386_s0, %s238_s16  ;;  %s17_s13 = int_to_ptr.vmem [resolvable:$true] %s16_s13 }
   0x4   :  { %p242_p1 = scmp.lt.u32.totalorder %s238_s16, %s386_s0 }
   0x6   :  { %p244_p2 = pnand %p242_p1, %p239_p0 }
   0x8   :  { %247 = shalt.err (!%p244_p2)
}
   0x9   :  { %s248_s21 = scalar_lea.vmem %s17_s13, 256  ;;  %p253_p4 = scmp.lt.s32.totalorder %s17_s13, %s17_s13 }
   0xa   :  { %p249_p3 = scmp.ne.s32.totalorder %s17_s13, %s248_s21  ;;  %p254_p5 = scmp.lt.s32.totalorder %s248_s21, %s248_s21 }
   0xc   :  { %p255_p6 = por %p254_p5, %p253_p4 }
   0xe   :  { %p256_p7 = pnand %p255_p6, %p249_p3 }
  0x10   :  { %259 = shalt.err (!%p256_p7)
}
  0x11   :  { %s311_s22 = smov 128   ;;  %s312_s23 = smov 8  }
  0x12   :  { %22 = dma.hbm_to_vmem [thread:$0]  %s386_s0, 256, %s17_s13, [#allocation4], %s311_s22, %s311_s22, %s312_s23  }
  0x13   :  { %s313_s26 = smov [#allocation6]   ;;  %s260_s30 = scalar_lea.hbm %s387_s1, 512 }
  0x14   :  { %s28_s27 = sshll.u32 %s313_s26, 4  ;;  %p261_p8 = scmp.ne.s32.totalorder %s387_s1, %s260_s30  ;;  %s29_s27 = int_to_ptr.vmem [resolvable:$true] %s28_s27 }
  0x15   :  { %p264_p9 = scmp.lt.u32.totalorder %s260_s30, %s387_s1 }
  0x17   :  { %p266_p10 = pnand %p264_p9, %p261_p8 }
  0x19   :  { %269 = shalt.err (!%p266_p10)
}
  0x1a   :  { %s270_s8 = scalar_lea.vmem %s29_s27, 512  ;;  %p275_p12 = scmp.lt.s32.totalorder %s29_s27, %s29_s27 }
  0x1b   :  { %p271_p11 = scmp.ne.s32.totalorder %s29_s27, %s270_s8  ;;  %p276_p13 = scmp.lt.s32.totalorder %s270_s8, %s270_s8 }
  0x1d   :  { %p277_p0 = por %p276_p13, %p275_p12 }
  0x1f   :  { %p278_p1 = pnand %p277_p0, %p271_p11 }
  0x21   :  { %281 = shalt.err (!%p278_p1)
}
  0x22   :  { %34 = dma.hbm_to_vmem [thread:$0]  %s387_s1, 512, %s29_s27, [#allocation7], %s311_s22, %s311_s22, %s312_s23  }
  0x23   :  { %304 = dma.done.wait [#allocation4], 256  }
  0x24   :  { %305 = vsyncadd [#allocation4], 4294967040 }
  0x25   :  { %306 = dma.done.wait [#allocation7], 512  }
  0x26   :  { %307 = vsyncadd [#allocation7], 4294966784  ;;  %vm47_vm0 = vcmask 261120   ;;  %v314_v0 = vmov 0.0|0.0   ;;  %v315_v1 = vmov 0.0   ;;  %vm316_vm1 = vmmov 0  }
  0x27   :  { %220 = vmatprep.subr.bf16.mxu0 %v314_v0  ;;  %48 = vst.msk [vmem:[#allocation2] sm:$0xff] %vm47_vm0, %v315_v1  ;;  %49 = vst.msk [vmem:[#allocation2 + $0x8] sm:$0xff] %vm47_vm0, %v315_v1  ;;  %217 = vmatprep.mubr.msk.f32.mxu0 %vm316_vm1, %v315_v1  ;;  %v80_v2 = vld [vmem:[#allocation6] sm:$0xff]  ;;  %v81_v3 = vld [vmem:[#allocation6 + $0x8] sm:$0xff]  ;;  %vm93_vm3 = vcmask 1041409   ;;  %s317_s11 = smov [#allocation8]  }
  0x28   :  { %vm222_vm2 = vmpackc.low %vm47_vm0, %vm47_vm0  ;;  %v221_v4 = vpack.c.bf16 %v81_v3, %v80_v2  ;;  %v52_v7 = vld [vmem:[#allocation3] sm:$0xff]  ;;  %v53_v8 = vld [vmem:[#allocation3 + $0x8] sm:$0xff]  ;;  %s188_s12 = sshll.u32 %s317_s11, 4  ;;  %vm180_vm4 = vcmask 254976   ;;  %s189_s12 = int_to_ptr.vmem [resolvable:$true] %s188_s12 }
  0x29   :  { %v82_v11 = vld [vmem:[#allocation6 + $0x10] sm:$0xff]  ;;  %v83_v12 = vld [vmem:[#allocation6 + $0x18] sm:$0xff]  ;;  %v198_v33 = vld [vmem:[%s388_s2] ss:$0 sm:$0xff]  ;;  %s282_s13 = scalar_lea.vmem %s189_s12, 32  ;;  %p287_p3 = scmp.lt.s32.totalorder %s189_s12, %s189_s12 }
  0x2a   :  { %223 = vmatpush3.bf16.xpose.msk.msra.mxu0 %vm222_vm2, %v221_v4  ;;  %v225_v13 = vpack.c.bf16 %v83_v12, %v82_v11  ;;  %p283_p2 = scmp.ne.s32.totalorder %s189_s12, %s282_s13  ;;  %p288_p4 = scmp.lt.s32.totalorder %s282_s13, %s282_s13 }
  0x2b   :  { %224 = vmatprep.subr.bf16.mxu0 %v314_v0 }
  0x2c   :  { %p289_p5 = por %p288_p4, %p287_p3 }
  0x2e   :  { %v50_v5 = vld [vmem:[#allocation2] sm:$0xff]  ;;  %v51_v6 = vld [vmem:[#allocation2 + $0x8] sm:$0xff]  ;;  %p290_p6 = pnand %p289_p5, %p283_p2 }
  0x2f   :  { %v54_v9 = vadd.f32 %v52_v7, %v50_v5  ;;  %v55_v10 = vadd.f32 %v53_v8, %v51_v6 }
  0x31   :  { %57 = vst.msk [vmem:[#allocation2] sm:$0xff] %vm47_vm0, %v54_v9  ;;  %58 = vst.msk [vmem:[#allocation2 + $0x8] sm:$0xff] %vm47_vm0, %v55_v10 }
  0x32   :  { %227 = vmatpush3.bf16.xpose.msk.msra.mxu0 %vm222_vm2, %v225_v13 }
  0x38   :  { %v62_v14 = vld [vmem:[#allocation2] sm:$0xff]  ;;  %v63_v15 = vld [vmem:[#allocation2 + $0x8] sm:$0xff] }
  0x39   :  { %v64_v16 = vsel %vm47_vm0, %v62_v14, 0.0  ;;  %v71_v17 = vsel %vm47_vm0, %v63_v15, 0.0 }
  0x3a   :  { %v65_v18 = vrot.slane %v64_v16, 4  ;;  %v72_v19 = vrot.slane %v71_v17, 4 }
  0x3c   :  { %v66_v20 = vadd.f32 %v65_v18, %v64_v16  ;;  %v73_v21 = vadd.f32 %v72_v19, %v71_v17 }
  0x3e   :  { %v67_v22 = vrot.slane %v66_v20, 2  ;;  %v74_v23 = vrot.slane %v73_v21, 2 }
  0x40   :  { %v68_v24 = vadd.f32 %v67_v22, %v66_v20  ;;  %v75_v25 = vadd.f32 %v74_v23, %v73_v21 }
  0x42   :  { %v69_v26 = vrot.slane %v68_v24, 1  ;;  %v76_v27 = vrot.slane %v75_v25, 1 }
  0x44   :  { %v70_v28 = vadd.f32 %v69_v26, %v68_v24  ;;  %v77_v29 = vadd.f32 %v76_v27, %v75_v25 }
  0x46   :  { %v78_v30 = vmul.f32 0.125, %v70_v28  ;;  %v79_v31 = vmul.f32 0.125, %v77_v29 }
  0x48   :  { %v94_v32 = vsel %vm93_vm3, %v79_v31, %v78_v30 }
  0x49   :  { %218 = vmatmul.mubr.msk.f32.vlgmr.msra.gmra.mrb[0].mxu0 %vm47_vm0, %v94_v32 }
 0x11c   :  { %v175_v34 = vpop.f32.mrb[0].mxu0 }
 0x11d   :  { %v176_v35 = vadd.f32 %v198_v33, %v175_v34  ;;  %v219_v36 = vpop.f32.mrb[1].mxu0 }
 0x11f   :  { %236 = vtanh.f32 %v176_v35 }
 0x129   :  { %v237_v37 = vpop.eup %236 }
 0x12a   :  { %181 = vst.msk [vmem:[#allocation8] sm:$0x3] %vm180_vm4, %v237_v37 }
 0x12b   :  { %293 = shalt.err (!%p290_p6)
}
 0x12c   :  { %s294_s2 = scalar_lea.hbm %s389_s3, 32 }
 0x12d   :  { %p295_p7 = scmp.ne.s32.totalorder %s389_s3, %s294_s2  ;;  %p298_p8 = scmp.lt.u32.totalorder %s294_s2, %s389_s3 }
 0x12f   :  { %p300_p9 = pnand %p298_p8, %p295_p7 }
 0x131   :  { %303 = shalt.err (!%p300_p9)
}
 0x132   :  { %191 = dma.vmem_to_hbm [thread:$0]  %s189_s12, 32, %s389_s3, [#allocation5]  }
 0x133   :  { %308 = dma.done.wait [#allocation5], 32  }
 0x134   :  { %309 = vsyncadd [#allocation5], 4294967264 }
 0x135   :  { %195 = vsyncpa [#allocation4], 1 }
 0x136   :  { %196 = vsyncpa [#allocation7], 1 }
 0x137   :  { %197 = vsyncpa [#allocation5], 1 }

</bundles_post_ra>
